<compile_context>
chip_gen: v5e
topology: v5e:2x2
jax: 0.10.0
libtpu: 0.0.40
codegen_flags: <defaults>
</compile_context>

<pallas_src>
import functools

import jax
import jax.numpy as jnp
from jax.experimental import pallas as pl
from jax.experimental.pallas import tpu as pltpu


def _round_up(n, m):
    return ((n + m - 1) // m) * m


# ---------------------------------------------------------------------------
# Kernel A: batch-on-lanes (net_width < 128).
#   x_ref  : [state_dim, tile_b]      (xᵀ tile, batch on lanes)
#   w1_ref : [net_width, state_dim]   (W1ᵀ)
#   w2_ref : [net_width, net_width]   (W2ᵀ)
#   wh_ref : [2*action_dim, net_width](fused alpha|beta head, transposed)
#   b12_ref: [net_width, 2]           (b1 | b2 as columns, f32)
#   bh_ref : [2*action_dim, 1]        (ba|bb, f32)
#   out_ref: [2*action_dim, tile_b]   (lane-dense output slab)
# ---------------------------------------------------------------------------
def beta_actor_kernel_lanes(x_ref, w1_ref, w2_ref, wh_ref, b12_ref, bh_ref,
                            out_ref):
    dot = functools.partial(jnp.dot, preferred_element_type=jnp.float32)
    cd = w1_ref.dtype                       # matmul compute dtype (f32 or bf16)
    x = x_ref[...].astype(cd)
    h1 = jnp.tanh(dot(w1_ref[...], x) + b12_ref[:, 0:1])
    h2 = jnp.tanh(dot(w2_ref[...], h1.astype(cd)) + b12_ref[:, 1:2])
    head = dot(wh_ref[...], h2.astype(cd)) + bh_ref[...]
    out_ref[...] = jax.nn.softplus(head) + 1.0


# ---------------------------------------------------------------------------
# Kernel B: batch-on-sublanes (net_width >= 128), natural x @ W layout.
#   x_ref  : [tile_b, state_dim]
#   w1_ref : [state_dim, net_width]
#   w2_ref : [net_width, net_width]
#   wh_ref : [net_width, 2*action_dim]
#   b12_ref: [2, net_width]
#   bh_ref : [1, 2*action_dim]
#   out_ref: [tile_b, 2*action_dim]
# ---------------------------------------------------------------------------
def beta_actor_kernel_rows(x_ref, w1_ref, w2_ref, wh_ref, b12_ref, bh_ref,
                           out_ref):
    dot = functools.partial(jnp.dot, preferred_element_type=jnp.float32)
    cd = w1_ref.dtype
    x = x_ref[...].astype(cd)
    h1 = jnp.tanh(dot(x, w1_ref[...]) + b12_ref[0:1, :])
    h2 = jnp.tanh(dot(h1.astype(cd), w2_ref[...]) + b12_ref[1:2, :])
    head = dot(h2.astype(cd), wh_ref[...]) + bh_ref[...]
    out_ref[...] = jax.nn.softplus(head) + 1.0


def _select_tile_b(B, state_dim, net_width, two_ad, lane_align, max_tile_b,
                   vmem_budget_bytes):
    """Shape-derived batch tile.  lane_align = 128 (lanes) or 8 (sublanes)."""
    # Per batch element: double-buffered x + out tiles plus h1/h2 intermediates.
    per_elem = 4 * (2 * state_dim + 2 * two_ad + 2 * net_width)
    cap = vmem_budget_bytes // max(per_elem, 1)
    cap = max(lane_align, (cap // lane_align) * lane_align)
    cap = min(cap, max_tile_b)

    if B <= 2 * lane_align:
        # Tiny batch: one grid step, block spans the whole (unaligned) axis.
        return B
    # >= 2 grid steps so both v7x TensorCores participate; aligned tile.
    tile_b = min(cap, _round_up(pl.cdiv(B, 2), lane_align))
    return max(tile_b, lane_align)


def beta_actor_forward(x, params, *, max_tile_b=8192,
                       vmem_budget_bytes=16 * 1024 * 1024):
    """x: [B, state_dim] float32.  Returns (alpha, beta), each [B, action_dim]."""
    B, state_dim = x.shape
    lanes_layout = params["layout"] == "batch_lanes"
    if lanes_layout:
        net_width = params["w1"].shape[0]
        two_ad = params["wh"].shape[0]
    else:
        net_width = params["w1"].shape[1]
        two_ad = params["wh"].shape[1]
    action_dim = two_ad // 2

    # Advisory cost estimate so XLA schedules/overlaps the call sensibly.
    w_bytes = int((params["w1"].size + params["w2"].size + params["wh"].size)
                  * params["w1"].dtype.itemsize
                  + (params["b12"].size + params["bh"].size) * 4)
    cost = pl.CostEstimate(
        flops=int(2 * B * (state_dim * net_width + net_width * net_width
                           + net_width * two_ad)),
        transcendentals=int(B * (2 * net_width + two_ad)),
        bytes_accessed=int(B * (state_dim + two_ad) * 4 + w_bytes),
    )

    lane_align = 128 if lanes_layout else 8
    tile_b = _select_tile_b(B, state_dim, net_width, two_ad, lane_align,
                            max_tile_b, vmem_budget_bytes)
    grid = (pl.cdiv(B, tile_b),)   # ragged final block handled by Pallas

    if lanes_layout:
        kernel = beta_actor_kernel_lanes
        kernel_inputs = (x.T, params["w1"], params["w2"], params["wh"],
                         params["b12"], params["bh"])
        in_specs = [
            pl.BlockSpec((state_dim, tile_b), lambda i: (0, i)),      # xᵀ tile
            pl.BlockSpec((net_width, state_dim), lambda i: (0, 0)),   # W1ᵀ resident
            pl.BlockSpec((net_width, net_width), lambda i: (0, 0)),   # W2ᵀ resident
            pl.BlockSpec((two_ad, net_width), lambda i: (0, 0)),      # Whᵀ resident
            pl.BlockSpec((net_width, 2), lambda i: (0, 0)),           # b1|b2
            pl.BlockSpec((two_ad, 1), lambda i: (0, 0)),              # ba|bb
        ]
        out_specs = pl.BlockSpec((two_ad, tile_b), lambda i: (0, i))
        out_shape = jax.ShapeDtypeStruct((two_ad, B), jnp.float32)
    else:
        kernel = beta_actor_kernel_rows
        kernel_inputs = (x, params["w1"], params["w2"], params["wh"],
                         params["b12"], params["bh"])
        in_specs = [
            pl.BlockSpec((tile_b, state_dim), lambda i: (i, 0)),      # x tile
            pl.BlockSpec((state_dim, net_width), lambda i: (0, 0)),
            pl.BlockSpec((net_width, net_width), lambda i: (0, 0)),
            pl.BlockSpec((net_width, two_ad), lambda i: (0, 0)),
            pl.BlockSpec((2, net_width), lambda i: (0, 0)),
            pl.BlockSpec((1, two_ad), lambda i: (0, 0)),
        ]
        out_specs = pl.BlockSpec((tile_b, two_ad), lambda i: (i, 0))
        out_shape = jax.ShapeDtypeStruct((B, two_ad), jnp.float32)

    out = pl.pallas_call(
        kernel,
        out_shape=out_shape,
        grid=grid,
        in_specs=in_specs,
        out_specs=out_specs,
        cost_estimate=cost,
        compiler_params=pltpu.CompilerParams(
            dimension_semantics=("parallel",),
            vmem_limit_bytes=32 * 1024 * 1024,   # safe on v5e/v6e/v7x
        ),
    )(*kernel_inputs)

    if lanes_layout:
        alpha = out[:action_dim, :].T
        beta = out[action_dim:, :].T
    else:
        alpha = out[:, :action_dim]
        beta = out[:, action_dim:]
    return alpha, beta


def init_params(key, state_dim, action_dim, net_width, dtype=jnp.float32):
    """nn.Linear-style U(-1/sqrt(fan_in), 1/sqrt(fan_in)) init, stored in the
    fused layout the kernel consumes.  `dtype` controls matmul weight storage
    (use jnp.bfloat16 on v6e/v7x if desired); biases stay f32."""
    def linear(k, fan_in, fan_out):
        kw, kb = jax.random.split(k)
        bound = 1.0 / jnp.sqrt(jnp.float32(fan_in))
        w = jax.random.uniform(kw, (fan_in, fan_out), jnp.float32, -bound, bound)
        b = jax.random.uniform(kb, (fan_out,), jnp.float32, -bound, bound)
        return w, b

    k1, k2, k3, k4 = jax.random.split(key, 4)
    w1, b1 = linear(k1, state_dim, net_width)
    w2, b2 = linear(k2, net_width, net_width)
    wa, ba = linear(k3, net_width, action_dim)
    wb, bb = linear(k4, net_width, action_dim)
    wh = jnp.concatenate([wa, wb], axis=1)          # [net_width, 2*action_dim]
    bh = jnp.concatenate([ba, bb])                  # [2*action_dim]

    if net_width < 128:
        # Batch-on-lanes layout: weights transposed, biases as columns.
        return dict(
            layout="batch_lanes",
            w1=w1.T.astype(dtype),                  # [net_width, state_dim]
            w2=w2.T.astype(dtype),                  # [net_width, net_width]
            wh=wh.T.astype(dtype),                  # [2*action_dim, net_width]
            b12=jnp.stack([b1, b2], axis=1),        # [net_width, 2]
            bh=bh[:, None],                         # [2*action_dim, 1]
        )
    return dict(
        layout="batch_rows",
        w1=w1.astype(dtype),
        w2=w2.astype(dtype),
        wh=wh.astype(dtype),
        b12=jnp.stack([b1, b2], axis=0),            # [2, net_width]
        bh=bh[None, :],                             # [1, 2*action_dim]
    )


def reference_forward(x, p):
    """Pure-JAX reference (same math as the PyTorch module)."""
    if p["layout"] == "batch_lanes":
        w1, w2, wh = p["w1"].T, p["w2"].T, p["wh"].T
        b1, b2, bh = p["b12"][:, 0], p["b12"][:, 1], p["bh"][:, 0]
    else:
        w1, w2, wh = p["w1"], p["w2"], p["wh"]
        b1, b2, bh = p["b12"][0], p["b12"][1], p["bh"][0]
    w1 = w1.astype(jnp.float32)
    w2 = w2.astype(jnp.float32)
    wh = wh.astype(jnp.float32)
    h1 = jnp.tanh(x @ w1 + b1)
    h2 = jnp.tanh(h1 @ w2 + b2)
    head = jax.nn.softplus(h2 @ wh + bh) + 1.0
    ad = head.shape[1] // 2
    return head[:, :ad], head[:, ad:]


if __name__ == "__main__":
    key = jax.random.PRNGKey(0)
    k_params, k_x, k_big = jax.random.split(key, 3)

    # Small shapes implied by the module.
    state_dim, action_dim, net_width = 8, 4, 32
    params = init_params(k_params, state_dim, action_dim, net_width)

    # Tiny batch (single grid step, batch-on-lanes path).
    x = jax.random.normal(k_x, (2, state_dim), jnp.float32)
    alpha, beta = beta_actor_forward(x, params)
    jax.block_until_ready((alpha, beta))
    a_ref, b_ref = reference_forward(x, params)
    assert alpha.shape == (2, action_dim) and beta.shape == (2, action_dim)
    assert jnp.allclose(alpha, a_ref, atol=1e-5, rtol=1e-5)
    assert jnp.allclose(beta, b_ref, atol=1e-5, rtol=1e-5)
    # softplus(z) + 1 >= 1 (== 1 only if softplus underflows to exactly 0).
    assert bool(jnp.all(alpha >= 1.0)) and bool(jnp.all(beta >= 1.0))

    # Larger ragged batch: multi-step grid, masked final block, no host padding.
    xb = jax.random.normal(k_big, (1030, state_dim), jnp.float32)
    a_big, b_big = beta_actor_forward(xb, params)
    jax.block_until_ready((a_big, b_big))
    a_big_ref, b_big_ref = reference_forward(xb, params)
    assert jnp.allclose(a_big, a_big_ref, atol=1e-5, rtol=1e-5)
    assert jnp.allclose(b_big, b_big_ref, atol=1e-5, rtol=1e-5)

    # Wide-hidden path (net_width >= 128 -> batch-on-sublanes layout), ragged grid.
    params_w = init_params(jax.random.PRNGKey(1), state_dim, action_dim, 128)
    xw = jax.random.normal(jax.random.PRNGKey(2), (300, state_dim), jnp.float32)
    a_w, b_w = beta_actor_forward(xw, params_w)
    jax.block_until_ready((a_w, b_w))
    a_w_ref, b_w_ref = reference_forward(xw, params_w)
    assert jnp.allclose(a_w, a_w_ref, atol=1e-5, rtol=1e-5)
    assert jnp.allclose(b_w, b_w_ref, atol=1e-5, rtol=1e-5)

    print("KERNEL_OK")
</pallas_src>

<mosaic_0001>
module attributes {stable_mosaic.version = 11 : i64} {
  func.func @beta_actor_kernel_lanes(%arg0: i32, %arg1: memref<8x2xf32, #tpu.memory_space<vmem>>, %arg2: memref<32x8xf32, #tpu.memory_space<vmem>>, %arg3: memref<32x32xf32, #tpu.memory_space<vmem>>, %arg4: memref<8x32xf32, #tpu.memory_space<vmem>>, %arg5: memref<32x2xf32, #tpu.memory_space<vmem>>, %arg6: memref<8x1xf32, #tpu.memory_space<vmem>>, %arg7: memref<8x2xf32, #tpu.memory_space<vmem>>) attributes {dimension_semantics = [#tpu.dimension_semantics<parallel>], iteration_bounds = array<i64: 1>, scalar_prefetch = 0 : i64, scratch_operands = 0 : i64, tpu.core_type = #tpu.core_type<tc>, window_params = [{transform_indices = @transform_0, window_bounds = array<i64: 8, 2>}, {pipeline_mode = #tpu.pipeline_mode<synchronous>, transform_indices = @transform_1, window_bounds = array<i64: 32, 8>}, {pipeline_mode = #tpu.pipeline_mode<synchronous>, transform_indices = @transform_2, window_bounds = array<i64: 32, 32>}, {pipeline_mode = #tpu.pipeline_mode<synchronous>, transform_indices = @transform_3, window_bounds = array<i64: 8, 32>}, {pipeline_mode = #tpu.pipeline_mode<synchronous>, transform_indices = @transform_4, window_bounds = array<i64: 32, 2>}, {pipeline_mode = #tpu.pipeline_mode<synchronous>, transform_indices = @transform_5, window_bounds = array<i64: 8, 1>}, {transform_indices = @transform_6, window_bounds = array<i64: 8, 2>}]} {
    %c0 = arith.constant 0 : index
    %c0_0 = arith.constant 0 : index
    %0 = vector.load %arg1[%c0, %c0_0] : memref<8x2xf32, #tpu.memory_space<vmem>>, vector<8x2xf32>
    %c0_1 = arith.constant 0 : index
    %c0_2 = arith.constant 0 : index
    %1 = vector.load %arg2[%c0_1, %c0_2] : memref<32x8xf32, #tpu.memory_space<vmem>>, vector<32x8xf32>
    %cst = arith.constant dense<0.000000e+00> : vector<32x2xf32>
    %2 = tpu.matmul %1, %0, %cst {dimension_numbers = #tpu.dot_dimension_numbers<[1], [0], [0], [1], [0, 0, 1, 1], [], []>} : vector<32x8xf32>, vector<8x2xf32>, vector<32x2xf32> -> vector<32x2xf32>
    %c0_3 = arith.constant 0 : index
    %c0_4 = arith.constant 0 : index
    %3 = vector.load %arg5[%c0_3, %c0_4] : memref<32x2xf32, #tpu.memory_space<vmem>>, vector<32x1xf32>
    %4 = vector.broadcast %3 : vector<32x1xf32> to vector<32x2xf32>
    %5 = arith.addf %2, %4 : vector<32x2xf32>
    %6 = math.tanh %5 : vector<32x2xf32>
    %c0_5 = arith.constant 0 : index
    %c0_6 = arith.constant 0 : index
    %7 = vector.load %arg3[%c0_5, %c0_6] : memref<32x32xf32, #tpu.memory_space<vmem>>, vector<32x32xf32>
    %cst_7 = arith.constant dense<0.000000e+00> : vector<32x2xf32>
    %8 = tpu.matmul %7, %6, %cst_7 {dimension_numbers = #tpu.dot_dimension_numbers<[1], [0], [0], [1], [0, 0, 1, 1], [], []>} : vector<32x32xf32>, vector<32x2xf32>, vector<32x2xf32> -> vector<32x2xf32>
    %c0_8 = arith.constant 0 : index
    %c1 = arith.constant 1 : index
    %9 = vector.load %arg5[%c0_8, %c1] : memref<32x2xf32, #tpu.memory_space<vmem>>, vector<32x1xf32>
    %10 = vector.broadcast %9 : vector<32x1xf32> to vector<32x2xf32>
    %11 = arith.addf %8, %10 : vector<32x2xf32>
    %12 = math.tanh %11 : vector<32x2xf32>
    %c0_9 = arith.constant 0 : index
    %c0_10 = arith.constant 0 : index
    %13 = vector.load %arg4[%c0_9, %c0_10] : memref<8x32xf32, #tpu.memory_space<vmem>>, vector<8x32xf32>
    %cst_11 = arith.constant dense<0.000000e+00> : vector<8x2xf32>
    %14 = tpu.matmul %13, %12, %cst_11 {dimension_numbers = #tpu.dot_dimension_numbers<[1], [0], [0], [1], [0, 0, 1, 1], [], []>} : vector<8x32xf32>, vector<32x2xf32>, vector<8x2xf32> -> vector<8x2xf32>
    %c0_12 = arith.constant 0 : index
    %c0_13 = arith.constant 0 : index
    %15 = vector.load %arg6[%c0_12, %c0_13] : memref<8x1xf32, #tpu.memory_space<vmem>>, vector<8x1xf32>
    %16 = vector.broadcast %15 : vector<8x1xf32> to vector<8x2xf32>
    %17 = arith.addf %14, %16 : vector<8x2xf32>
    %cst_14 = arith.constant 0.000000e+00 : f32
    %18 = vector.broadcast %cst_14 : f32 to vector<8x2xf32>
    %19 = arith.maximumf %17, %18 : vector<8x2xf32>
    %20 = vector.broadcast %cst_14 : f32 to vector<8x2xf32>
    %21 = arith.subf %17, %20 : vector<8x2xf32>
    %22 = arith.cmpf one, %21, %21 : vector<8x2xf32>
    %23 = vector.broadcast %cst_14 : f32 to vector<8x2xf32>
    %24 = arith.addf %17, %23 : vector<8x2xf32>
    %25 = math.absf %21 : vector<8x2xf32>
    %cst_15 = arith.constant 0.000000e+00 : f32
    %26 = vector.broadcast %cst_15 : f32 to vector<8x2xf32>
    %27 = arith.subf %26, %25 : vector<8x2xf32>
    %28 = math.exp %27 : vector<8x2xf32>
    %29 = math.log1p %28 : vector<8x2xf32>
    %30 = arith.addf %19, %29 : vector<8x2xf32>
    %31 = arith.select %22, %24, %30 : vector<8x2xi1>, vector<8x2xf32>
    %cst_16 = arith.constant 1.000000e+00 : f32
    %32 = vector.broadcast %cst_16 : f32 to vector<8x2xf32>
    %33 = arith.addf %31, %32 : vector<8x2xf32>
    %c0_17 = arith.constant 0 : index
    %c0_18 = arith.constant 0 : index
    %34 = vector.load %arg7[%c0_17, %c0_18] : memref<8x2xf32, #tpu.memory_space<vmem>>, vector<8x2xf32>
    tpu.vector_store %arg7[%c0_17, %c0_18], %33 {strides = array<i32>} : memref<8x2xf32, #tpu.memory_space<vmem>>, vector<8x2xf32>,
    return
  }
  func.func @transform_0(%arg0: i32) -> (i32, i32) {
    %c0_i32 = arith.constant 0 : i32
    %c0_i32_0 = arith.constant 0 : i32
    return %c0_i32, %arg0 : i32, i32
  }
  func.func @transform_1(%arg0: i32) -> (i32, i32) {
    %c0_i32 = arith.constant 0 : i32
    %c0_i32_0 = arith.constant 0 : i32
    %c0_i32_1 = arith.constant 0 : i32
    return %c0_i32, %c0_i32_0 : i32, i32
  }
  func.func @transform_2(%arg0: i32) -> (i32, i32) {
    %c0_i32 = arith.constant 0 : i32
    %c0_i32_0 = arith.constant 0 : i32
    %c0_i32_1 = arith.constant 0 : i32
    return %c0_i32, %c0_i32_0 : i32, i32
  }
  func.func @transform_3(%arg0: i32) -> (i32, i32) {
    %c0_i32 = arith.constant 0 : i32
    %c0_i32_0 = arith.constant 0 : i32
    %c0_i32_1 = arith.constant 0 : i32
    return %c0_i32, %c0_i32_0 : i32, i32
  }
  func.func @transform_4(%arg0: i32) -> (i32, i32) {
    %c0_i32 = arith.constant 0 : i32
    %c0_i32_0 = arith.constant 0 : i32
    %c0_i32_1 = arith.constant 0 : i32
    return %c0_i32, %c0_i32_0 : i32, i32
  }
  func.func @transform_5(%arg0: i32) -> (i32, i32) {
    %c0_i32 = arith.constant 0 : i32
    %c0_i32_0 = arith.constant 0 : i32
    %c0_i32_1 = arith.constant 0 : i32
    return %c0_i32, %c0_i32_0 : i32, i32
  }
  func.func @transform_6(%arg0: i32) -> (i32, i32) {
    %c0_i32 = arith.constant 0 : i32
    %c0_i32_0 = arith.constant 0 : i32
    return %c0_i32, %arg0 : i32, i32
  }
}

</mosaic_0001>

<bundles_post_ra>
// kernel: tpu_custom_call.1
= control target key start
LH: loop header
LB: loop body
LE: loop exit
PB: predicated region body
PF: predicated region fallthrough
CT: control target
= control target key end

     0   :  { %vm52_vm0 = vcmask 64512   ;;  %v262_v2 = vmov 0   ;;  %v263_v16 = vmov 1   ;;  %vm118_vm1 = vcmask 261120   ;;  %s356_s0 = inlined_call_operand.vmem [shape: f32[8,2], index: 0, kind: input, shape index: {}]   ;;  %s357_s1 = inlined_call_operand.vmem [shape: f32[32,8], index: 1, kind: input, shape index: {}]   ;;  %s358_s4 = inlined_call_operand.vmem [shape: f32[32,2], index: 4, kind: input, shape index: {}]   ;;  %s359_s2 = inlined_call_operand.vmem [shape: f32[32,32], index: 2, kind: input, shape index: {}]   ;;  %s360_s5 = inlined_call_operand.vmem [shape: f32[8,1], index: 5, kind: input, shape index: {}]   ;;  %s361_s3 = inlined_call_operand.vmem [shape: f32[8,32], index: 3, kind: input, shape index: {}]   ;;  %s362_s6 = inlined_call_operand.vmem [shape: f32[8,2], index: 6, kind: output, shape index: {}]  }
   0x1   :  { %v23_v0 = vld [vmem:[%s356_s0] sm:$0xff]  ;;  %236 = vset.pattern.permute.xlu1 %v262_v2  ;;  %v27_v3 = vld [vmem:[%s357_s1 + $0x18] sm:$0xff]  ;;  %235 = vset.pattern.permute.xlu0 %v262_v2  ;;  %v29_v4 = vld [vmem:[%s358_s4 + $0x8] sm:$0xff]  ;;  %vm213_vm4 = vcmask 15360  }
   0x2   :  { %v24_v1 = vld [vmem:[%s357_s1] sm:$0xff]  ;;  %80 = vmatpush.msra.mxu0 %v23_v0  ;;  %228 = vmatpush.msra.mxu2 %v23_v0  ;;  %v31_v5 = vld [vmem:[%s358_s4 + $0x18] sm:$0xff]  ;;  %v25_v6 = vld [vmem:[%s357_s1 + $0x8] sm:$0xff] }
   0x3   :  { %219 = vmatmul.msk.f32.vlgmr.msra.gmra.mxu0 %vm52_vm0, %v24_v1  ;;  %222 = vmatmul.msk.f32.vlgmr.msra.gmra.mxu2 %vm52_vm0, %v27_v3  ;;  %v28_v7 = vld [vmem:[%s358_s4] sm:$0xff]  ;;  %v30_v8 = vld [vmem:[%s358_s4 + $0x10] sm:$0xff]  ;;  %v101_v29 = vld [vmem:[%s359_s2 + $0x18] sm:$0xff] }
   0x4   :  { %39 = vperm.xlu1 %236, %v29_v4   ;;  %49 = vperm.xlu0 %235, %v31_v5   ;;  %v26_v9 = vld [vmem:[%s357_s1 + $0x10] sm:$0xff]  ;;  %v98_v27 = vld [vmem:[%s359_s2] sm:$0xff]  ;;  %v99_v30 = vld [vmem:[%s359_s2 + $0x8] sm:$0xff] }
   0x5   :  { %237 = vset.pattern.permute.xlu2 %v263_v16  ;;  %v100_v26 = vld [vmem:[%s359_s2 + $0x10] sm:$0xff]  ;;  %v165_v31 = vld [vmem:[%s360_s5] sm:$0xff] }
   0x6   :  { %115 = vperm.xlu2 %237, %v31_v5   ;;  %v164_v47 = vld [vmem:[%s361_s3] sm:$0xff] }
   0xb   :  { %220 = vmatmul.msk.f32.gmra.mxu0 %vm52_vm0, %v25_v6 }
   0xc   :  { %34 = vperm.xlu1 %236, %v28_v7   ;;  %44 = vperm.xlu0 %235, %v30_v8  }
   0xe   :  { %111 = vperm.xlu2 %237, %v30_v8  }
  0x13   :  { %221 = vmatmul.msk.f32.gmra.mxu0 %vm52_vm0, %v26_v9 }
  0x14   :  { %239 = vset.pattern.permute.xlu1 %v263_v16  ;;  %238 = vset.pattern.permute.xlu0 %v263_v16 }
  0x15   :  { %103 = vperm.xlu1 %239, %v28_v7   ;;  %107 = vperm.xlu0 %238, %v29_v4  }
  0x16   :  { %240 = vset.pattern.permute.xlu2 %v262_v2 }
  0x17   :  { %168 = vperm.xlu2 %240, %v165_v31  }
  0x1d   :  { %241 = vset.pattern.permute.xlu0 %v262_v2 }
  0x60   :  { %v116_v32 = vpop.permute.xlu2 %115 }
  0x68   :  { %v112_v35 = vpop.permute.xlu2 %111 }
  0x71   :  { %v169_v49 = vpop.permute.xlu2 %168 }
  0x76   :  { %v40_v11 = vpop.permute.xlu1 %39  ;;  %v50_v12 = vpop.permute.xlu0 %49 }
  0x7e   :  { %v35_v18 = vpop.permute.xlu1 %34  ;;  %v45_v19 = vpop.permute.xlu0 %44 }
  0x80   :  { %v82_v10 = vpop.f32.mrf.mxu0 }
  0x81   :  { %v83_v23 = vadd.f32 %v82_v10, %v35_v18 }
  0x86   :  { %v91_v13 = vpop.f32.mrf.mxu2 }
  0x87   :  { %v92_v14 = vadd.f32 %v91_v13, %v50_v12  ;;  %v108_v36 = vpop.permute.xlu0 %107  ;;  %v104_v42 = vpop.permute.xlu1 %103 }
  0x88   :  { %v85_v15 = vpop.f32.mrf.mxu0 }
  0x89   :  { %242 = vtanh.f32 %v92_v14  ;;  %v86_v21 = vadd.f32 %v85_v15, %v40_v11 }
  0x8f   :  { %v243_v17 = vpop.eup %242 }
  0x90   :  { %v88_v20 = vpop.f32.mrf.mxu0  ;;  %143 = vmatpush.msra.mxu1 %v243_v17  ;;  %229 = vmatpush.msra.mxu3 %v243_v17 }
  0x91   :  { %v89_v22 = vadd.f32 %v88_v20, %v45_v19 }
  0x93   :  { %244 = vtanh.f32 %v89_v22 }
  0x94   :  { %246 = vtanh.f32 %v86_v21 }
  0x95   :  { %248 = vtanh.f32 %v83_v23 }
  0x99   :  { %v245_v24 = vpop.eup %244 }
  0x9a   :  { %144 = vmatpush.msra.mxu1 %v245_v24  ;;  %230 = vmatpush.msra.mxu3 %v245_v24  ;;  %v247_v25 = vpop.eup %246 }
  0x9b   :  { %v249_v28 = vpop.eup %248 }
  0x9c   :  { %145 = vmatpush.msra.mxu1 %v247_v25  ;;  %231 = vmatpush.msra.mxu3 %v247_v25 }
  0x9e   :  { %146 = vmatpush.msra.mxu1 %v249_v28  ;;  %232 = vmatpush.msra.mxu3 %v249_v28 }
  0x9f   :  { %225 = vmatmul.msk.f32.vlgmr.msra.gmra.mxu3 %vm118_vm1, %v100_v26  ;;  %223 = vmatmul.msk.f32.vlgmr.msra.gmra.mxu1 %vm118_vm1, %v98_v27 }
  0xa7   :  { %226 = vmatmul.msk.f32.gmra.mxu3 %vm118_vm1, %v101_v29  ;;  %224 = vmatmul.msk.f32.gmra.mxu1 %vm118_vm1, %v99_v30 }
 0x11c   :  { %v148_v33 = vpop.f32.mrf.mxu1 }
 0x11d   :  { %v149_v43 = vadd.f32 %v148_v33, %v104_v42 }
 0x122   :  { %v154_v34 = vpop.f32.mrf.mxu3 }
 0x123   :  { %v155_v38 = vadd.f32 %v154_v34, %v112_v35 }
 0x124   :  { %v151_v37 = vpop.f32.mrf.mxu1 }
 0x125   :  { %v152_v41 = vadd.f32 %v151_v37, %v108_v36 }
 0x12a   :  { %v157_v39 = vpop.f32.mrf.mxu3 }
 0x12b   :  { %v158_v40 = vadd.f32 %v157_v39, %v116_v32 }
 0x12d   :  { %250 = vtanh.f32 %v158_v40 }
 0x12e   :  { %252 = vtanh.f32 %v155_v38 }
 0x12f   :  { %254 = vtanh.f32 %v152_v41 }
 0x130   :  { %256 = vtanh.f32 %v149_v43 }
 0x133   :  { %v251_v44 = vpop.eup %250 }
 0x134   :  { %v253_v45 = vpop.eup %252  ;;  %186 = vmatpush.msrb.mxu2 %v251_v44 }
 0x135   :  { %v255_v46 = vpop.eup %254 }
 0x136   :  { %187 = vmatpush.msrb.mxu2 %v253_v45  ;;  %v257_v48 = vpop.eup %256 }
 0x138   :  { %188 = vmatpush.msrb.mxu2 %v255_v46 }
 0x13a   :  { %189 = vmatpush.msrb.mxu2 %v257_v48 }
 0x13b   :  { %227 = vmatmul.msk.f32.vlgmr.msrb.gmra.mxu2 %vm118_vm1, %v164_v47 }
 0x1be   :  { %v191_v50 = vpop.f32.mrf.mxu2 }
 0x1bf   :  { %v192_v51 = vadd.f32 %v191_v50, %v169_v49 }
 0x1c1   :  { %v197_v52 = vand.u32 2147483647, %v192_v51  ;;  %v194_v63 = vmax.f32 %v192_v51, 0.0  ;;  %vm195_vm3 = vcmp.ne.f32.partialorder %v192_v51, %v192_v51 }
 0x1c3   :  { %v198_v53 = vsub.f32 0.0, %v197_v52 }
 0x1c5   :  { %v199_v54 = vmul.f32 1.442695, %v198_v53 }
 0x1c7   :  { %258 = vpow2.f32 %v199_v54 }
 0x1cd   :  { %v259_v55 = vpop.eup %258 }
 0x1ce   :  { %v201_v56 = vadd.f32 1.0, %v259_v55  ;;  %v204_v57 = vmul.f32 -0.5, %v259_v55  ;;  %v207_v59 = vand.u32 2147483647, %v259_v55 }
 0x1d0   :  { %260 = vlog2.f32 %v201_v56  ;;  %v205_v58 = vadd.f32 1.0, %v204_v57  ;;  %vm208_vm2 = vcmp.lt.f32.partialorder %v207_v59, 0.0004427343 }
 0x1d2   :  { %v206_v62 = vmul.f32 %v259_v55, %v205_v58 }
 0x1d6   :  { %v261_v60 = vpop.eup %260 }
 0x1d7   :  { %v203_v61 = vmul.f32 0.6931472, %v261_v60 }
 0x1d9   :  { %v209_v0 = vsel %vm208_vm2, %v206_v62, %v203_v61 }
 0x1da   :  { %v210_v1 = vadd.f32 %v209_v0, %v194_v63 }
 0x1dc   :  { %v211_v2 = vsel %vm195_vm3, %v192_v51, %v210_v1 }
 0x1dd   :  { %v212_v3 = vadd.f32 1.0, %v211_v2 }
 0x1df   :  { %214 = vst.msk [vmem:[%s362_s6] sm:$0xff] %vm213_vm4, %v212_v3 }

</bundles_post_ra>
